<compile_context>
chip_gen: v7x
topology: tpu7x:2x2x1
jax: 0.10.0
libtpu: 0.0.40
codegen_flags: <defaults>
</compile_context>

<pallas_src>
import math
import functools

import jax
import jax.numpy as jnp
from jax import lax
from jax.experimental import pallas as pl
from jax.experimental.pallas import tpu as pltpu


# ----------------------------------------------------------------------------
# Buffer construction (deterministic glue, matches torch __init__ exactly)
# ----------------------------------------------------------------------------
def make_pe_table(d_model: int, max_len: int) -> jnp.ndarray:
    """Returns pe of shape (max_len, 1, d_model), float32."""
    position = jnp.arange(max_len, dtype=jnp.float32)[:, None]              # (L, 1)
    div_term = jnp.exp(
        jnp.arange(0, d_model, 2, dtype=jnp.float32) * (-math.log(10000.0) / d_model)
    )                                                                        # (D/2,)
    pe = jnp.zeros((max_len, d_model), dtype=jnp.float32)
    pe = pe.at[:, 0::2].set(jnp.sin(position * div_term))
    pe = pe.at[:, 1::2].set(jnp.cos(position * div_term))
    # unsqueeze(0).transpose(0, 1) -> (max_len, 1, d_model)
    return pe[:, None, :]


# ----------------------------------------------------------------------------
# Pallas kernels
# ----------------------------------------------------------------------------
def _pe_add_kernel(x_ref, pe_ref, o_ref):
    # x_ref: (TILE_S, B, D)   pe_ref: (TILE_S, 1, D)  -> broadcast add over B
    y = x_ref[...].astype(jnp.float32) + pe_ref[...]
    o_ref[...] = y.astype(o_ref.dtype)


def _pe_add_dropout_kernel(seed_ref, x_ref, pe_ref, o_ref, *,
                           rate: float, tile_s: int, batch: int, d_model: int):
    # Fused positional add + inverted dropout (training mode).
    # NOTE: stochastic, so it cannot bit-match torch's RNG; semantics match.
    y = x_ref[...].astype(jnp.float32) + pe_ref[...]
    shape = y.shape  # (tile_s, B, D)

    # Counter-based PRNG: hash of (global element index, seed).  Uses only
    # jnp/lax integer ops (VPU), so it lowers on TPU and in interpret mode,
    # and the mask does not depend on the tiling.
    row = lax.broadcasted_iota(jnp.int32, shape, 0) + pl.program_id(0) * tile_s
    bi = lax.broadcasted_iota(jnp.int32, shape, 1)
    di = lax.broadcasted_iota(jnp.int32, shape, 2)
    idx = (row * batch + bi) * d_model + di                       # global linear idx
    mixed = idx ^ (seed_ref[0] * jnp.int32(-1640531527))          # 0x9E3779B9
    h = lax.bitcast_convert_type(mixed, jnp.uint32)
    h = h ^ (h >> 16)
    h = h * jnp.uint32(0x7FEB352D)
    h = h ^ (h >> 15)
    h = h * jnp.uint32(0x846CA68B)
    h = h ^ (h >> 16)

    threshold = jnp.uint32(min(int(rate * 4294967296.0), 4294967295))
    inv_keep = jnp.float32(1.0 / (1.0 - rate))   # folded as a constant
    o_ref[...] = jnp.where(h >= threshold, y * inv_keep,
                           jnp.float32(0.0)).astype(o_ref.dtype)


# ----------------------------------------------------------------------------
# VMEM budget (generation aware) and tile sizing
# ----------------------------------------------------------------------------
def _cdiv(a: int, b: int) -> int:
    return -(-a // b)


def _vmem_budget():
    """Returns (tile_budget_bytes, vmem_limit_bytes)."""
    vmem_cap = 128 * 1024 * 1024
    try:
        vmem_cap = int(pltpu.get_tpu_info().vmem_capacity_bytes)
    except Exception:
        pass  # not on a TPU (e.g. interpret mode) -> conservative default
    # v5e/v6e (128 MiB physical): 64 MiB scoped limit; v7x (64 MiB): 32 MiB.
    vmem_limit = max(16 * 1024 * 1024, min(64 * 1024 * 1024, vmem_cap // 2))
    tile_budget = (vmem_limit * 3) // 4  # leave headroom for compiler scratch
    return tile_budget, vmem_limit


def _choose_tile_s(S: int, B: int, D: int, x_bytes: int,
                   budget_bytes: int, training: bool) -> int:
    # Per row of S (double-buffered pipeline blocks + in-kernel temporaries):
    per_row = 2 * 2 * B * D * x_bytes       # x + out blocks, 2x buffered
    per_row += 2 * 1 * D * 4                # pe block (f32), 2x buffered
    per_row += B * D * 4                    # f32 add intermediate
    if training:
        per_row += 3 * B * D * 4            # iota / hash / mask intermediates
    rows = max(1, budget_bytes // max(per_row, 1))
    rows = min(rows, S, 2048)
    # Balanced tiles, and >= 2 grid steps so v7x's two TCs can both stream.
    num_tiles = max(2, _cdiv(S, rows))
    return max(1, _cdiv(S, num_tiles))


# ----------------------------------------------------------------------------
# Wrapper
# ----------------------------------------------------------------------------
def positional_encoding_forward(
    x: jnp.ndarray,
    pe: jnp.ndarray,
    *,
    dropout_rate: float = 0.1,
    training: bool = False,
    seed: int = 0,
) -> jnp.ndarray:
    """x: (S, B, D); pe: (max_len, 1, D).  Returns (S, B, D)."""
    S, B, D = x.shape
    max_len = pe.shape[0]
    assert S <= max_len, "sequence length exceeds positional-encoding table"
    assert dropout_rate < 1.0, "dropout_rate must be < 1 (1/(1-rate) scaling)"

    pe_f32 = pe.astype(jnp.float32)  # full table; BlockSpec windows rows [0, S)

    apply_dropout = training and dropout_rate > 0.0
    tile_budget, vmem_limit = _vmem_budget()
    tile_s = _choose_tile_s(S, B, D, x.dtype.itemsize, tile_budget, apply_dropout)
    grid = (_cdiv(S, tile_s),)

    out_shape = jax.ShapeDtypeStruct((S, B, D), x.dtype)
    cparams = pltpu.CompilerParams(
        dimension_semantics=("parallel",),   # S-tiles are independent
        vmem_limit_bytes=vmem_limit,
    )

    if not apply_dropout:
        # Eval mode (or rate==0): dropout is identity -> plain broadcast add.
        return pl.pallas_call(
            _pe_add_kernel,
            out_shape=out_shape,
            grid_spec=pltpu.PrefetchScalarGridSpec(
                num_scalar_prefetch=0,
                grid=grid,
                in_specs=[
                    pl.BlockSpec((tile_s, B, D), lambda i: (i, 0, 0)),
                    pl.BlockSpec((tile_s, 1, D), lambda i: (i, 0, 0)),
                ],
                out_specs=pl.BlockSpec((tile_s, B, D), lambda i: (i, 0, 0)),
            ),
            compiler_params=cparams,
        )(x, pe_f32)

    # Training mode: fused add + inverted dropout inside the kernel.
    seed_arr = jnp.array([seed], dtype=jnp.int32)
    kernel = functools.partial(
        _pe_add_dropout_kernel,
        rate=float(dropout_rate), tile_s=tile_s, batch=B, d_model=D,
    )
    return pl.pallas_call(
        kernel,
        out_shape=out_shape,
        grid_spec=pltpu.PrefetchScalarGridSpec(
            num_scalar_prefetch=1,
            grid=grid,
            in_specs=[
                pl.BlockSpec((tile_s, B, D), lambda i, seed_r: (i, 0, 0)),
                pl.BlockSpec((tile_s, 1, D), lambda i, seed_r: (i, 0, 0)),
            ],
            out_specs=pl.BlockSpec((tile_s, B, D), lambda i, seed_r: (i, 0, 0)),
        ),
        compiler_params=cparams,
    )(seed_arr, x, pe_f32)


# ----------------------------------------------------------------------------
# Demo / self-test
# ----------------------------------------------------------------------------
if __name__ == "__main__":
    # Small shapes consistent with the module: x is (seq, batch, d_model)
    S, B, D = 8, 2, 32
    MAX_LEN = 10
    RATE = 0.1

    key = jax.random.PRNGKey(0)
    x = jax.random.normal(key, (S, B, D), dtype=jnp.float32)

    pe = make_pe_table(d_model=D, max_len=MAX_LEN)
    ref = x + pe[:S].astype(x.dtype)

    # --- Eval-mode forward (dropout = identity), matches module.eval() ------
    out = positional_encoding_forward(x, pe, dropout_rate=RATE, training=False)
    out = jax.block_until_ready(out)
    assert out.shape == (S, B, D)
    assert jnp.allclose(out, ref, atol=1e-6), "eval-mode mismatch vs reference"

    # --- Training-mode forward (fused add + inverted dropout) ---------------
    out_tr = positional_encoding_forward(
        x, pe, dropout_rate=RATE, training=True, seed=1234
    )
    out_tr = jax.block_until_ready(out_tr)
    assert out_tr.shape == (S, B, D)
    # Every element must be either dropped (0) or the scaled reference value.
    scaled = ref / (1.0 - RATE)
    ok = jnp.isclose(out_tr, 0.0, atol=1e-6) | jnp.isclose(out_tr, scaled, atol=1e-5)
    assert bool(jnp.all(ok)), "training-mode dropout values inconsistent"

    print("KERNEL_OK")
</pallas_src>

<mosaic_0001>
module attributes {stable_mosaic.version = 11 : i64} {
  func.func @_pe_add_kernel(%arg0: i32, %arg1: memref<4x2x32xf32, #tpu.memory_space<vmem>>, %arg2: memref<4x1x32xf32, #tpu.memory_space<vmem>>, %arg3: memref<4x2x32xf32, #tpu.memory_space<vmem>>) attributes {dimension_semantics = [#tpu.dimension_semantics<parallel>], iteration_bounds = array<i64: 2>, scalar_prefetch = 0 : i64, scratch_operands = 0 : i64, tpu.core_type = #tpu.core_type<tc>, window_params = [{transform_indices = @transform_0, window_bounds = array<i64: 4, 2, 32>}, {transform_indices = @transform_1, window_bounds = array<i64: 4, 1, 32>}, {transform_indices = @transform_2, window_bounds = array<i64: 4, 2, 32>}]} {
    %c0 = arith.constant 0 : index
    %c0_0 = arith.constant 0 : index
    %c0_1 = arith.constant 0 : index
    %0 = vector.load %arg1[%c0, %c0_0, %c0_1] : memref<4x2x32xf32, #tpu.memory_space<vmem>>, vector<4x2x32xf32>
    %c0_2 = arith.constant 0 : index
    %c0_3 = arith.constant 0 : index
    %c0_4 = arith.constant 0 : index
    %1 = vector.load %arg2[%c0_2, %c0_3, %c0_4] : memref<4x1x32xf32, #tpu.memory_space<vmem>>, vector<4x1x32xf32>
    %2 = vector.broadcast %1 : vector<4x1x32xf32> to vector<4x2x32xf32>
    %3 = arith.addf %0, %2 : vector<4x2x32xf32>
    %c0_5 = arith.constant 0 : index
    %c0_6 = arith.constant 0 : index
    %c0_7 = arith.constant 0 : index
    %4 = vector.load %arg3[%c0_5, %c0_6, %c0_7] : memref<4x2x32xf32, #tpu.memory_space<vmem>>, vector<4x2x32xf32>
    tpu.vector_store %arg3[%c0_5, %c0_6, %c0_7], %3 {strides = array<i32>} : memref<4x2x32xf32, #tpu.memory_space<vmem>>, vector<4x2x32xf32>,
    return
  }
  func.func @transform_0(%arg0: i32) -> (i32, i32, i32) {
    %c0_i32 = arith.constant 0 : i32
    %c0_i32_0 = arith.constant 0 : i32
    %c0_i32_1 = arith.constant 0 : i32
    return %arg0, %c0_i32, %c0_i32_0 : i32, i32, i32
  }
  func.func @transform_1(%arg0: i32) -> (i32, i32, i32) {
    %c0_i32 = arith.constant 0 : i32
    %c0_i32_0 = arith.constant 0 : i32
    %c0_i32_1 = arith.constant 0 : i32
    return %arg0, %c0_i32, %c0_i32_0 : i32, i32, i32
  }
  func.func @transform_2(%arg0: i32) -> (i32, i32, i32) {
    %c0_i32 = arith.constant 0 : i32
    %c0_i32_0 = arith.constant 0 : i32
    %c0_i32_1 = arith.constant 0 : i32
    return %arg0, %c0_i32, %c0_i32_0 : i32, i32, i32
  }
}

</mosaic_0001>

<bundles_post_ra>
// kernel: tpu_custom_call.1
= control target key start
LH: loop header
LB: loop body
LE: loop exit
PB: predicated region body
PF: predicated region fallthrough
CT: control target
= control target key end

     0   :  { %7 = vsyncpa [#allocation3], 0  ;;  %s803_s0 = inlined_call_operand.hbm [shape: f32[8,2,32], index: 0, kind: input, shape index: {}]   ;;  %s804_s1 = inlined_call_operand.hbm [shape: f32[10,1,32], index: 1, kind: input, shape index: {}]   ;;  %s805_s2 = inlined_call_operand.hbm [shape: f32[8,2,32], index: 2, kind: output, shape index: {}]  }
   0x1   :  { %9 = vsyncpa [#allocation3 + $0x1], 0 }
   0x2   :  { %10 = vsyncpa [#allocation6], 0 }
   0x3   :  { %12 = vsyncpa [#allocation6 + $0x1], 0 }
   0x4   :  { %13 = vsyncpa [#allocation4], 0 }
   0x5   :  { %15 = vsyncpa [#allocation4 + $0x1], 0  ;;  %s592_s9 = smov 0   ;;  %s594_s10 = smov 0  }
   0x6   :  { %s596_s11 = smov 0   ;;  %s598_s12 = smov 0  }
   0x7 LB: > { %s613_s13 = sadd.s32 4294967295, %s566_s12   ;;  %s365_s14 = sadd.s32 4294967294, %s566_s12   ;;  %s566_s12 = sphi %s598_s12, %s818_s12   ;;  %s562_s11 = sphi %s596_s11, %s817_s11   ;;  %s558_s10 = sphi %s594_s10, %s816_s10   ;;  %s554_s9 = sphi %s592_s9, %s815_s9  }
   0x8   : > { %s617_s15 = sadd.s32 1, %s566_s12   ;;  %s28_s16 = sadd.s32 1, %s562_s11 }
   0x9   : > { %s25_s17 = ssub.s32 %s566_s12, %s617_s15  ;;  %p35_p0 = scmp.ne.s32.totalorder %s562_s11, %s558_s10 }
   0xa   : > { %p26_p1 = scmp.eq.s32.totalorder %s25_s17, 0  ;;  %p36_p2 = scmp.eq.s32.totalorder %s566_s12, 0 }
   0xb   : > { %p41_p3 = scmp.ne.s32.totalorder %s558_s10, %s554_s9  ;;  %p42_p4 = scmp.eq.s32.totalorder %s613_s13, 0 }
   0xc   : > { %s629_s18 = scalar_select %p26_p1, %s562_s11, %s28_s16  }
   0xd   : > { %p631_p5 = por %p36_p2, %p35_p0  ;;  %p635_p6 = por %p42_p4, %p41_p3 }
   0xe   : > { %p91_p7 = scmp.eq.s32.totalorder %s613_s13, 1  ;;  %p97_p8 = scmp.eq.s32.totalorder %s365_s14, 1 }
   0xf   : > { %p806_p11 = scmp.ge.s32.totalorder %s566_s12, 2 }
  0x10   : > { %p640_p9 = por %p91_p7, %p35_p0  ;;  %p644_p10 = por %p97_p8, %p41_p3 }
  0x11   : > { %113 = sbr.rel (%p806_p11) target bundleno = 81 (0x51), region = 16  ;;  %s652_s23 = sand.u32 (!%p806_p11), 1, %s562_s11  }
  0x12   : > { %s810_s21 = scalar_select %p640_p9, 1, 0 }
  0x13   : > { %s811_s22 = scalar_select %p644_p10, 1, 0 }
  0x14   : > { %s389_s24 = sshll.u32 (!%p806_p11), %s566_s12, 7  ;;  %s368_s25 = sshll.u32 (!%p806_p11), %s652_s23, 3 }
  0x15   : > { %s659_s28 = scalar_lea.hbm (!%p806_p11), %s803_s0, %s389_s24  ;;  %s121_s29 = scalar_lea.vmem (!%p806_p11), [#allocation2], %s368_s25 }
  0x16   : > { %s128_s30 = sshll.u32 (!%p806_p11), %s121_s29, 4  ;;  %s118_s3 = scalar_lea.sflag (!%p806_p11), [#allocation3], %s652_s23  ;;  %s661_s30 = int_to_ptr.vmem [resolvable:$true] %s128_s30 }
  0x17   : > { %s440_s4 = scalar_lea.hbm (!%p806_p11), %s659_s28, 128  ;;  %s444_s7 = scalar_lea.hbm (!%p806_p11), %s803_s0, 256 }
  0x18   : > { %p441_p12 = scmp.ne.s32.totalorder %s659_s28, %s440_s4  ;;  %p445_p1 = scmp.lt.u32.totalorder %s659_s28, %s803_s0 }
  0x19   : > { %p446_p2 = scmp.lt.u32.totalorder %s444_s7, %s440_s4  ;;  %p448_p4 = scmp.lt.u32.totalorder %s440_s4, %s659_s28 }
  0x1a   : > { %p442_p13 = pnand %p441_p12, %p631_p5 }
  0x1b   : > { %p447_p3 = por %p446_p2, %p445_p1 }
  0x1c   : > { %p443_p0 = pneg %p442_p13 }
  0x1d   : > { %p449_p7 = por %p448_p4, %p447_p3 }
  0x1f   : > { %p450_p8 = pnand %p449_p7, %p443_p0 }
  0x21   : > { %453 = shalt.err (!%p450_p8)
}
  0x22   : > { %s454_s16 = scalar_lea.vmem %s661_s30, 128  ;;  %s568_s17 = smov [#allocation2]  }
  0x23   : > { %p455_p12 = scmp.ne.s32.totalorder %s661_s30, %s454_s16  ;;  %s458_s24 = sshll.u32 %s568_s17, 4  ;;  %s459_s24 = int_to_ptr.vmem [resolvable:$false] %s458_s24 }
  0x24   : > { %s460_s25 = scalar_lea.vmem %s459_s24, 256  ;;  %p461_p10 = scmp.lt.s32.totalorder %s661_s30, %s459_s24 }
  0x25   : > { %p456_p13 = pnand %p455_p12, %p631_p5  ;;  %p462_p9 = scmp.lt.s32.totalorder %s460_s25, %s454_s16 }
  0x27   : > { %p457_p11 = pneg %p456_p13  ;;  %p463_p1 = por %p462_p9, %p461_p10 }
  0x29   : > { %p464_p2 = pnand %p463_p1, %p457_p11 }
  0x2b   : > { %467 = shalt.err (!%p464_p2)
}
  0x2c   : > { %s569_s26 = smov 32   ;;  %s570_s27 = smov 2  }
  0x2d   : > { %392 = dma.hbm_to_vmem [thread:$0]  (%p631_p5), %s659_s28, 128, %s661_s30, %s118_s3, %s569_s26, %s569_s26, %s570_s27  }
  0x2e   : > { %137 = sbr.rel (!%p631_p5) target bundleno = 81 (0x51), region = 24  ;;  %s371_s29 = sshll.u32 (%p631_p5), %s652_s23, 2 }
  0x2f   : > { %s372_s4 = sshll.u32 (%p631_p5), %s566_s12, 2  ;;  %s139_s8 = scalar_lea.sflag (%p631_p5), [#allocation6], %s652_s23 }
  0x30   : > { %s144_s5 = ssub.s32 (%p631_p5), 10, %s372_s4  ;;  %s142_s14 = scalar_lea.vmem (%p631_p5), [#allocation5], %s371_s29 }
  0x31   : > { %p145_p9 = scmp.lt.s32.totalorder (%p631_p5), %s144_s5, 4 }
  0x35   : > { %s820_s5 = smov (!%p145_p9, %s144_s5), 4 }
  0x36   : > { %s691_s6 = sshll.u32 %s820_s5, 4 }
  0x37   : > { %s149_s7 = ssub.s32 64, %s691_s6 }
  0x38   : > { %150 = vsyncadd %s139_s8, %s149_s7  ;;  %p374_p5 = scmp.ne.s32.totalorder %s691_s6, 0  ;;  %s390_s19 = sshll.u32 %s566_s12, 6 }
  0x39   : > { %s702_s3 = scalar_lea.hbm %s804_s1, %s390_s19  ;;  %s154_s16 = sshll.u32 %s142_s14, 4  ;;  %s704_s16 = int_to_ptr.vmem [resolvable:$true] %s154_s16 }
  0x3a   : > { %s468_s17 = scalar_lea.hbm %s702_s3, %s691_s6  ;;  %s472_s26 = scalar_lea.hbm %s804_s1, 160 }
  0x3b   : > { %p469_p10 = scmp.ne.s32.totalorder %s702_s3, %s468_s17  ;;  %p473_p3 = scmp.lt.u32.totalorder %s702_s3, %s804_s1 }
  0x3c   : > { %p474_p4 = scmp.lt.u32.totalorder %s472_s26, %s468_s17  ;;  %p476_p8 = scmp.lt.u32.totalorder %s468_s17, %s702_s3 }
  0x3d   : > { %p470_p11 = pnand %p469_p10, %p374_p5 }
  0x3e   : > { %p475_p7 = por %p474_p4, %p473_p3 }
  0x3f   : > { %p471_p0 = pneg %p470_p11 }
  0x40   : > { %p477_p12 = por %p476_p8, %p475_p7 }
  0x42   : > { %p478_p13 = pnand %p477_p12, %p471_p0 }
  0x44   : > { %481 = shalt.err (!%p478_p13)
}
  0x45   : > { %s482_s4 = scalar_lea.vmem %s704_s16, %s691_s6  ;;  %s571_s5 = smov [#allocation5]  }
  0x46   : > { %p483_p1 = scmp.ne.s32.totalorder %s704_s16, %s482_s4  ;;  %s486_s7 = sshll.u32 %s571_s5, 4  ;;  %s487_s7 = int_to_ptr.vmem [resolvable:$false] %s486_s7 }
  0x47   : > { %s488_s14 = scalar_lea.vmem %s487_s7, 128  ;;  %p489_p10 = scmp.lt.s32.totalorder %s704_s16, %s487_s7 }
  0x48   : > { %p484_p2 = pnand %p483_p1, %p374_p5  ;;  %p490_p11 = scmp.lt.s32.totalorder %s488_s14, %s482_s4 }
  0x4a   : > { %p485_p9 = pneg %p484_p2  ;;  %p491_p3 = por %p490_p11, %p489_p10 }
  0x4c   : > { %p492_p4 = pnand %p491_p3, %p485_p9 }
  0x4e   : > { %495 = shalt.err (!%p492_p4)
}
  0x4f   : > { %s572_s19 = smov 16   ;;  %s573_s28 = smov 1  }
  0x50   : > { %160 = dma.hbm_to_vmem [thread:$0]  (%p374_p5), %s702_s3, %s691_s6, %s704_s16, %s139_s8, %s572_s19, %s572_s19, %s573_s28  }
  0x51 PF: > { %p376_p0 = scmp.ge.s32.totalorder %s566_s12, 1  ;;  %p162_p7 = scmp.lt.s32.totalorder %s566_s12, 3 }
  0x53   : > { %p163_p8 = pnand %p376_p0, %p162_p7 }
  0x54   : > { %s735_s30 = sand.u32 (!%p163_p8), 1, %s558_s10  }
  0x55   : > { %166 = sbr.rel (%p163_p8) target bundleno = 124 (0x7c), region = 28  ;;  %s377_s17 = sshll.u32 (!%p163_p8), %s735_s30, 3 }
  0x56   : > { %s169_s24 = scalar_lea.sflag (!%p163_p8), [#allocation3], %s735_s30  ;;  %s172_s25 = scalar_lea.vmem (!%p163_p8), [#allocation2], %s377_s17 }
  0x5c   : > { %541 = dma.done.wait (%p635_p6), %s169_s24, 128  }
  0x5d   : > { %543 = vsyncadd (%p635_p6), %s169_s24, 4294967168  ;;  %s378_s23 = sshll.u32 %s735_s30, 2  ;;  %s178_s6 = scalar_lea.sflag [#allocation6], %s735_s30 }
  0x5e   : > { %s181_s8 = scalar_lea.vmem [#allocation5], %s378_s23 }
  0x5f   : > { %545 = dma.done.wait (%p635_p6), %s178_s6, 64  }
  0x60   : > { %547 = vsyncadd (%p635_p6), %s178_s6, 4294967232  ;;  %vm250_vm0 = vcmask 254976   ;;  %s206_s3 = scalar_lea.vmem [#allocation7], %s377_s17  ;;  %s391_s26 = sshll.u32 %s613_s13, 7  ;;  %v214_v0 = vld [vmem:[%s172_s25] sm:$0x3] }
  0x61   : > { %s269_s16 = sshll.u32 %s206_s3, 4  ;;  %v380_v1 = vld [vmem:[%s181_s8] ss:$0 sm:$0xff]  ;;  %v215_v2 = vld [vmem:[%s172_s25 + $0x2] sm:$0x3]  ;;  %s755_s13 = scalar_lea.hbm %s805_s2, %s391_s26  ;;  %s750_s16 = int_to_ptr.vmem [resolvable:$true] %s269_s16 }
  0x62   : > { %v246_v3 = vadd.f32 %v380_v1, %v214_v0  ;;  %v381_v4 = vld [vmem:[%s181_s8 + $0x1] ss:$0 sm:$0xff]  ;;  %v216_v5 = vld [vmem:[%s172_s25 + $0x4] sm:$0x3]  ;;  %v382_v6 = vld [vmem:[%s181_s8 + $0x2] ss:$0 sm:$0xff] }
  0x63   : > { %v247_v7 = vadd.f32 %v381_v4, %v215_v2  ;;  %v248_v8 = vadd.f32 %v382_v6, %v216_v5  ;;  %v217_v9 = vld [vmem:[%s172_s25 + $0x6] sm:$0x3]  ;;  %v383_v10 = vld [vmem:[%s181_s8 + $0x3] ss:$0 sm:$0xff]  ;;  %s256_s29 = scalar_lea.sflag [#allocation4], %s735_s30  ;;  %s496_s4 = scalar_lea.vmem %s750_s16, 128 }
  0x64   : > { %251 = vst.msk [vmem:[%s206_s3] sm:$0x3] %vm250_vm0, %v246_v3  ;;  %v249_v11 = vadd.f32 %v383_v10, %v217_v9  ;;  %p497_p6 = scmp.ne.s32.totalorder %s750_s16, %s496_s4  ;;  %p812_p5 = scmp.ne.s32.totalorder %s810_s21, 0 }
  0x65   : > { %252 = vst.msk [vmem:[%s206_s3 + $0x2] sm:$0x3] %vm250_vm0, %v247_v7  ;;  %253 = vst.msk [vmem:[%s206_s3 + $0x4] sm:$0x3] %vm250_vm0, %v248_v8  ;;  %s574_s5 = smov [#allocation7]  }
  0x66   : > { %254 = vst.msk [vmem:[%s206_s3 + $0x6] sm:$0x3] %vm250_vm0, %v249_v11  ;;  %p498_p12 = pnand %p497_p6, %p812_p5  ;;  %s500_s7 = sshll.u32 %s574_s5, 4  ;;  %s501_s7 = int_to_ptr.vmem [resolvable:$false] %s500_s7 }
  0x67   : > { %s502_s14 = scalar_lea.vmem %s501_s7, 256  ;;  %p503_p1 = scmp.lt.s32.totalorder %s750_s16, %s501_s7 }
  0x68   : > { %p499_p13 = pneg %p498_p12  ;;  %p504_p2 = scmp.lt.s32.totalorder %s502_s14, %s496_s4 }
  0x6a   : > { %p505_p9 = por %p504_p2, %p503_p1 }
  0x6c   : > { %p506_p10 = pnand %p505_p9, %p499_p13 }
  0x6e   : > { %509 = shalt.err (!%p506_p10)
}
  0x6f   : > { %s510_s19 = scalar_lea.hbm %s755_s13, 128  ;;  %s514_s24 = scalar_lea.hbm %s805_s2, 256 }
  0x70   : > { %p511_p11 = scmp.ne.s32.totalorder %s755_s13, %s510_s19  ;;  %p515_p0 = scmp.lt.u32.totalorder %s755_s13, %s805_s2 }
  0x71   : > { %p516_p7 = scmp.lt.u32.totalorder %s514_s24, %s510_s19  ;;  %p518_p6 = scmp.lt.u32.totalorder %s510_s19, %s755_s13 }
  0x72   : > { %p512_p3 = pnand %p511_p11, %p812_p5 }
  0x73   : > { %p517_p8 = por %p516_p7, %p515_p0 }
  0x74   : > { %p513_p4 = pneg %p512_p3 }
  0x75   : > { %p519_p12 = por %p518_p6, %p517_p8 }
  0x77   : > { %p520_p13 = pnand %p519_p12, %p513_p4 }
  0x79   : > { %523 = shalt.err (!%p520_p13)
}
  0x7a   : > { %s575_s6 = smov 32   ;;  %s576_s8 = smov 2  }
  0x7b   : > { %395 = dma.vmem_to_hbm [thread:$0]  (%p812_p5), %s750_s16, 128, %s755_s13, %s256_s29, %s575_s6, %s575_s6, %s576_s8  }
  0x7c PF: > { %s284_s3 = sand.u32 1, %s554_s9   ;;  %p813_p1 = scmp.ne.s32.totalorder %s811_s22, 0 }
  0x7d   : > { %p814_p2 = scmp.ge.s32.totalorder %s566_s12, 2  ;;  %s285_s26 = scalar_lea.sflag [#allocation4], %s284_s3 }
  0x7f   : > { %p398_p9 = pnand %p814_p2, %p813_p1 }
  0x81   : > { %549 = dma.done.wait (!%p398_p9), %s285_s26, 128  }
  0x82   : > { %551 = vsyncadd (!%p398_p9), %s285_s26, 4294967168  ;;  %p18_p10 = scmp.ge.s32.totalorder %s617_s15, 4   ;;  %s815_s9 = smov %s558_s10 }
  0x83   : > { %s816_s10 = smov %s562_s11  ;;  %s817_s11 = smov %s629_s18 }
  0x84   : > { %s818_s12 = smov %s617_s15  ;;  %20 = sbr.rel (!%p18_p10) target bundleno = 7 (0x7), region = 86 }
  0x8b   :  { %290 = vsyncpa [#allocation3], 1 }
  0x8c   :  { %292 = vsyncpa [#allocation3 + $0x1], 1 }
  0x8d   :  { %293 = vsyncpa [#allocation6], 1 }
  0x8e   :  { %295 = vsyncpa [#allocation6 + $0x1], 1 }
  0x8f   :  { %296 = vsyncpa [#allocation4], 1 }
  0x90   :  { %298 = vsyncpa [#allocation4 + $0x1], 1 }

</bundles_post_ra>
